<compile_context>
chip_gen: v7x
topology: tpu7x:2x2x1
jax: 0.10.0
libtpu: 0.0.40
codegen_flags: <defaults>
</compile_context>

<pallas_src>
import jax
import jax.numpy as jnp
from jax import lax
from jax.experimental import pallas as pl
from jax.experimental.pallas import tpu as pltpu


def _round_up(x, m):
    return ((x + m - 1) // m) * m


def _sse_kernel(w_ref, x_ref, o_ref):
    # w_ref : (1, Cp)    1x1-conv weight, channels zero-padded to Cp (sublane-aligned)
    # x_ref : (Cp, TM)   channels on sublanes, flattened N*H*W on lanes (lane-dense)
    # o_ref : (1, TM)
    z = jnp.dot(w_ref[...], x_ref[...],
                preferred_element_type=jnp.float32)          # MXU, f32 accumulation
    o_ref[...] = jax.nn.sigmoid(z).astype(o_ref.dtype)       # EUP logistic, lane-dense store


def sse_block(x_nchw, conv_weight, *, tile_m=512):
    """x_nchw: (N, Cin, H, W); conv_weight: (1, Cin, 1, 1) (PyTorch Conv2d layout)."""
    N, Cin, H, W = x_nchw.shape
    assert conv_weight.shape == (1, Cin, 1, 1)

    M = N * H * W                                 # everything but channels -> lanes
    Cp = _round_up(Cin, 8)                        # sublane-align the reduction dim
    tm = min(tile_m, _round_up(M, 128))           # lane tile, multiple of 128
    Mp = _round_up(M, tm)

    # Glue: layout / padding in plain JAX (XLA fuses these with neighbors).
    x_cm = jnp.transpose(x_nchw, (1, 0, 2, 3)).reshape(Cin, M)
    x_cm = jnp.pad(x_cm, ((0, Cp - Cin), (0, Mp - M)))
    w = jnp.pad(conv_weight.reshape(1, Cin), ((0, 0), (0, Cp - Cin)))
    w = w.astype(x_nchw.dtype)

    out_flat = pl.pallas_call(
        _sse_kernel,
        out_shape=jax.ShapeDtypeStruct((1, Mp), x_nchw.dtype),
        grid_spec=pltpu.PrefetchScalarGridSpec(
            num_scalar_prefetch=0,
            grid=(Mp // tm,),
            in_specs=[
                pl.BlockSpec((1, Cp), lambda i: (0, 0)),    # tiny constant weight
                pl.BlockSpec((Cp, tm), lambda i: (0, i)),   # lane-dense input tile
            ],
            out_specs=pl.BlockSpec((1, tm), lambda i: (0, i)),
        ),
        compiler_params=pltpu.CompilerParams(
            dimension_semantics=("parallel",)),             # shards across TCs on v7x
    )(w, x_cm)

    # Drop lane padding and restore NCHW with the single output channel.
    return out_flat[0, :M].reshape(N, H, W)[:, None, :, :]   # (N, 1, H, W)


def _reference(x_nchw, conv_weight):
    y = lax.conv_general_dilated(
        x_nchw, conv_weight, window_strides=(1, 1), padding="VALID",
        dimension_numbers=("NCHW", "OIHW", "NCHW"))
    return jax.nn.sigmoid(y)


if __name__ == "__main__":
    key = jax.random.PRNGKey(0)
    k1, k2 = jax.random.split(key)

    N, Cin, H, W = 2, 4, 16, 16
    x = jax.random.normal(k1, (N, Cin, H, W), dtype=jnp.float32)
    conv_weight = jax.random.normal(k2, (1, Cin, 1, 1), dtype=jnp.float32) * 0.5

    out = sse_block(x, conv_weight)
    out = jax.block_until_ready(out)

    ref = _reference(x, conv_weight)
    assert out.shape == (N, 1, H, W)
    assert jnp.allclose(out, ref, atol=1e-5, rtol=1e-5)

    print("KERNEL_OK")
</pallas_src>

<mosaic_0001>
module attributes {stable_mosaic.version = 11 : i64} {
  func.func @_sse_kernel(%arg0: i32, %arg1: memref<1x8xf32, #tpu.memory_space<vmem>>, %arg2: memref<8x512xf32, #tpu.memory_space<vmem>>, %arg3: memref<1x512xf32, #tpu.memory_space<vmem>>) attributes {dimension_semantics = [#tpu.dimension_semantics<parallel>], iteration_bounds = array<i64: 1>, scalar_prefetch = 0 : i64, scratch_operands = 0 : i64, tpu.core_type = #tpu.core_type<tc>, window_params = [{pipeline_mode = #tpu.pipeline_mode<synchronous>, transform_indices = @transform_0, window_bounds = array<i64: 1, 8>}, {transform_indices = @transform_1, window_bounds = array<i64: 8, 512>}, {transform_indices = @transform_2, window_bounds = array<i64: 1, 512>}]} {
    %c0 = arith.constant 0 : index
    %c0_0 = arith.constant 0 : index
    %0 = vector.load %arg1[%c0, %c0_0] : memref<1x8xf32, #tpu.memory_space<vmem>>, vector<1x8xf32>
    %c0_1 = arith.constant 0 : index
    %c0_2 = arith.constant 0 : index
    %1 = vector.load %arg2[%c0_1, %c0_2] : memref<8x512xf32, #tpu.memory_space<vmem>>, vector<8x512xf32>
    %cst = arith.constant dense<0.000000e+00> : vector<1x512xf32>
    %2 = tpu.matmul %0, %1, %cst {dimension_numbers = #tpu.dot_dimension_numbers<[1], [0], [0], [1], [0, 0, 1, 1], [], []>} : vector<1x8xf32>, vector<8x512xf32>, vector<1x512xf32> -> vector<1x512xf32>
    %3 = arith.negf %2 : vector<1x512xf32>
    %4 = math.exp %3 : vector<1x512xf32>
    %cst_3 = arith.constant 1.000000e+00 : f32
    %5 = vector.broadcast %cst_3 : f32 to vector<1x512xf32>
    %6 = arith.addf %5, %4 : vector<1x512xf32>
    %7 = arith.divf %5, %6 : vector<1x512xf32>
    %c0_4 = arith.constant 0 : index
    %c0_5 = arith.constant 0 : index
    %8 = vector.load %arg3[%c0_4, %c0_5] : memref<1x512xf32, #tpu.memory_space<vmem>>, vector<1x512xf32>
    tpu.vector_store %arg3[%c0_4, %c0_5], %7 {strides = array<i32>} : memref<1x512xf32, #tpu.memory_space<vmem>>, vector<1x512xf32>,
    return
  }
  func.func @transform_0(%arg0: i32) -> (i32, i32) {
    %c0_i32 = arith.constant 0 : i32
    %c0_i32_0 = arith.constant 0 : i32
    %c0_i32_1 = arith.constant 0 : i32
    return %c0_i32, %c0_i32_0 : i32, i32
  }
  func.func @transform_1(%arg0: i32) -> (i32, i32) {
    %c0_i32 = arith.constant 0 : i32
    %c0_i32_0 = arith.constant 0 : i32
    return %c0_i32, %arg0 : i32, i32
  }
  func.func @transform_2(%arg0: i32) -> (i32, i32) {
    %c0_i32 = arith.constant 0 : i32
    %c0_i32_0 = arith.constant 0 : i32
    return %c0_i32, %arg0 : i32, i32
  }
}

</mosaic_0001>

<bundles_post_ra>
// kernel: tpu_custom_call.1
= control target key start
LH: loop header
LB: loop body
LE: loop exit
PB: predicated region body
PF: predicated region fallthrough
CT: control target
= control target key end

     0   :  { %7 = vsyncpa [#allocation3], 0  ;;  %s416_s0 = inlined_call_operand.hbm [shape: f32[1,8], index: 0, kind: input, shape index: {}]   ;;  %s417_s1 = inlined_call_operand.hbm [shape: f32[8,512], index: 1, kind: input, shape index: {}]   ;;  %s418_s2 = inlined_call_operand.hbm [shape: f32[1,512], index: 2, kind: output, shape index: {}]  }
   0x1   :  { %8 = vsyncpa [#allocation6], 0 }
   0x2   :  { %9 = vsyncpa [#allocation4], 0  ;;  %s360_s9 = smov [#allocation2]   ;;  %s361_s11 = smov [#allocation5]  }
   0x3   :  { %s16_s10 = sshll.u32 %s360_s9, 4  ;;  %s26_s12 = sshll.u32 %s361_s11, 4  ;;  %s17_s10 = int_to_ptr.vmem [resolvable:$true] %s16_s10  ;;  %s27_s12 = int_to_ptr.vmem [resolvable:$true] %s26_s12 }
   0x4   :  { %s288_s15 = scalar_lea.hbm %s416_s0, 16 }
   0x5   :  { %p289_p0 = scmp.ne.s32.totalorder %s416_s0, %s288_s15  ;;  %p292_p1 = scmp.lt.u32.totalorder %s288_s15, %s416_s0 }
   0x7   :  { %p294_p2 = pnand %p292_p1, %p289_p0 }
   0x9   :  { %297 = shalt.err (!%p294_p2)
}
   0xa   :  { %s298_s20 = scalar_lea.vmem %s17_s10, 16  ;;  %s302_s21 = scalar_lea.vmem %s17_s10, 32 }
   0xb   :  { %p299_p3 = scmp.ne.s32.totalorder %s17_s10, %s298_s20  ;;  %p303_p4 = scmp.lt.s32.totalorder %s17_s10, %s17_s10 }
   0xc   :  { %p304_p5 = scmp.lt.s32.totalorder %s302_s21, %s298_s20 }
   0xe   :  { %p305_p6 = por %p304_p5, %p303_p4 }
  0x10   :  { %p306_p7 = pnand %p305_p6, %p299_p3 }
  0x12   :  { %309 = shalt.err (!%p306_p7)
}
  0x13   :  { %19 = dma.hbm_to_vmem [thread:$0]  %s416_s0, 16, %s17_s10, [#allocation3]  }
  0x14   :  { %s310_s26 = scalar_lea.hbm %s417_s1, 512 }
  0x15   :  { %p311_p8 = scmp.ne.s32.totalorder %s417_s1, %s310_s26  ;;  %p314_p9 = scmp.lt.u32.totalorder %s310_s26, %s417_s1 }
  0x17   :  { %p316_p10 = pnand %p314_p9, %p311_p8 }
  0x19   :  { %319 = shalt.err (!%p316_p10)
}
  0x1a   :  { %s320_s3 = scalar_lea.vmem %s27_s12, 512  ;;  %p325_p12 = scmp.lt.s32.totalorder %s27_s12, %s27_s12 }
  0x1b   :  { %p321_p11 = scmp.ne.s32.totalorder %s27_s12, %s320_s3  ;;  %p326_p13 = scmp.lt.s32.totalorder %s320_s3, %s320_s3 }
  0x1d   :  { %p327_p0 = por %p326_p13, %p325_p12 }
  0x1f   :  { %p328_p1 = pnand %p327_p0, %p321_p11 }
  0x21   :  { %331 = shalt.err (!%p328_p1)
}
  0x22   :  { %29 = dma.hbm_to_vmem [thread:$0]  %s417_s1, 512, %s27_s12, [#allocation6]  }
  0x23   :  { %354 = dma.done.wait [#allocation3], 16  }
  0x24   :  { %355 = vsyncadd [#allocation3], 4294967280 }
  0x25   :  { %356 = dma.done.wait [#allocation6], 512  }
  0x26   :  { %357 = vsyncadd [#allocation6], 4294966784  ;;  %v362_v0 = vmov 0.0   ;;  %v38_v1 = vld [vmem:[#allocation5 + $0x8] sm:$0xff]  ;;  %v40_v2 = vld [vmem:[#allocation5 + $0x18] sm:$0xff]  ;;  %vm41_vm0 = vcmask 64512   ;;  %v220_v24 = vlaneseq }
  0x27   :  { %109 = vmatprep.mubr.f32.mxu0 %v362_v0  ;;  %180 = vmatprep.mubr.f32.mxu1 %v362_v0  ;;  %v37_v3 = vld [vmem:[#allocation5] sm:$0xff]  ;;  %v39_v4 = vld [vmem:[#allocation5 + $0x10] sm:$0xff]  ;;  %v36_v5 = vld [vmem:[#allocation2] sm:$0x1]  ;;  %v363_v22 = vmov 1966171168  }
  0x28   :  { %45 = vmatprep.subr.mxu0 %v38_v1  ;;  %116 = vmatprep.subr.mxu1 %v40_v2  ;;  %v218_v23 = vunpack.c.l.s4 %v363_v22  ;;  %v221_v26 = vshrl.u32 %v220_v24, 7  ;;  %s364_s1 = smov [#allocation7]   ;;  %vm242_vm1 = vcmp.lt.s32.totalorder %v220_v24, 512 }
  0x29   :  { %46 = vmatpush1.msra.mxu0 %v37_v3  ;;  %117 = vmatpush1.msra.mxu1 %v39_v4  ;;  %s251_s5 = sshll.u32 %s364_s1, 4  ;;  %s252_s5 = int_to_ptr.vmem [resolvable:$true] %s251_s5 }
  0x2a   :  { %261 = vmatmul.mubr.msk.f32.vlgmr.msra.gmra.mrb[0].mxu0 %vm41_vm0, %v36_v5  ;;  %262 = vmatmul.mubr.msk.f32.vlgmr.msra.gmra.mrb[0].mxu1 %vm41_vm0, %v36_v5  ;;  %v219_v25 = vunpack.c.0.s8 %v218_v23  ;;  %s332_s6 = scalar_lea.vmem %s252_s5, 64  ;;  %p337_p3 = scmp.lt.s32.totalorder %s252_s5, %s252_s5 }
  0x2b   :  { %p333_p2 = scmp.ne.s32.totalorder %s252_s5, %s332_s6  ;;  %p338_p4 = scmp.lt.s32.totalorder %s332_s6, %s332_s6 }
  0x2c   :  { %v222_v29 = vsub.s32 %v219_v25, %v221_v26 }
  0x2d   :  { %p339_p5 = por %p338_p4, %p337_p3 }
  0x2f   :  { %p340_p6 = pnand %p339_p5, %p333_p2 }
  0xfd   :  { %v111_v6 = vpop.f32.mrb[0].mxu0  ;;  %v182_v7 = vpop.f32.mrb[0].mxu1 }
  0xfe   :  { %v263_v8 = vmul.f32 -1.442695, %v111_v6  ;;  %v265_v9 = vmul.f32 -1.442695, %v182_v7  ;;  %v113_v10 = vpop.f32.mrb[1].mxu0  ;;  %v184_v11 = vpop.f32.mrb[1].mxu1 }
  0xff   :  { %v264_v12 = vmul.f32 -1.442695, %v113_v10  ;;  %v266_v13 = vmul.f32 -1.442695, %v184_v11 }
 0x100   :  { %272 = vpow2.f32 %v263_v8 }
 0x101   :  { %274 = vpow2.f32 %v265_v9 }
 0x102   :  { %276 = vpow2.f32 %v264_v12 }
 0x103   :  { %278 = vpow2.f32 %v266_v13 }
 0x10a   :  { %v273_v14 = vpop.eup %272 }
 0x10b   :  { %v275_v15 = vpop.eup %274  ;;  %v199_v16 = vadd.f32 1.0, %v273_v14 }
 0x10c   :  { %v277_v17 = vpop.eup %276  ;;  %v201_v18 = vadd.f32 1.0, %v275_v15 }
 0x10d   :  { %v279_v19 = vpop.eup %278  ;;  %280 = vrcp.f32 %v199_v16  ;;  %v200_v20 = vadd.f32 1.0, %v277_v17 }
 0x10e   :  { %282 = vrcp.f32 %v201_v18  ;;  %v202_v21 = vadd.f32 1.0, %v279_v19 }
 0x10f   :  { %284 = vrcp.f32 %v200_v20 }
 0x110   :  { %286 = vrcp.f32 %v202_v21 }
 0x117   :  { %v281_v27 = vpop.eup %280 }
 0x118   :  { %v283_v28 = vpop.eup %282 }
 0x119   :  { %v285_v30 = vpop.eup %284 }
 0x11a   :  { %v287_v31 = vpop.eup %286  ;;  %v215_v32 = vcombine.low %v281_v27, %v285_v30 }
 0x11b   :  { %v216_v33 = vcombine.low %v283_v28, %v287_v31 }
 0x11c   :  { %v223_v34 = vrot.slane %v215_v32, %v222_v29 }
 0x11d   :  { %v230_v35 = vrot.slane %v216_v33, %v222_v29 }
 0x11f   :  { %v231_v36 = vcombine.low %v223_v34, %v230_v35 }
 0x121   :  { %v238_v37 = vrot.slane %v231_v36, %v222_v29 }
 0x123   :  { %244 = vst.msk [vmem:[#allocation7] sm:$0xf] %vm242_vm1, %v238_v37 }
 0x124   :  { %343 = shalt.err (!%p340_p6)
}
 0x125   :  { %s344_s9 = scalar_lea.hbm %s418_s2, 64 }
 0x126   :  { %p345_p7 = scmp.ne.s32.totalorder %s418_s2, %s344_s9  ;;  %p348_p8 = scmp.lt.u32.totalorder %s344_s9, %s418_s2 }
 0x128   :  { %p350_p9 = pnand %p348_p8, %p345_p7 }
 0x12a   :  { %353 = shalt.err (!%p350_p9)
}
 0x12b   :  { %254 = dma.vmem_to_hbm [thread:$0]  %s252_s5, 64, %s418_s2, [#allocation4]  }
 0x12c   :  { %358 = dma.done.wait [#allocation4], 64  }
 0x12d   :  { %359 = vsyncadd [#allocation4], 4294967232 }
 0x12e   :  { %258 = vsyncpa [#allocation3], 1 }
 0x12f   :  { %259 = vsyncpa [#allocation6], 1 }
 0x130   :  { %260 = vsyncpa [#allocation4], 1 }

</bundles_post_ra>
